<compile_context>
chip_gen: v6e
topology: v6e:2x2x1
jax: 0.10.0
libtpu: 0.0.40
codegen_flags: <defaults>
</compile_context>

<pallas_src>
import functools

import jax
import jax.numpy as jnp
from jax.experimental import pallas as pl
from jax.experimental.pallas import tpu as pltpu


def _mlp_kernel(num_hidden_layers, out_dim, carry_f32, *refs):
    """refs = (x_ref, w0, b0, w1, b1, ..., w_out, b_out, o_ref).

    The final weight/bias are lane-padded to 128 columns for an aligned MXU
    matmul; only the first `out_dim` columns are stored to HBM.
    """
    x_ref = refs[0]
    o_ref = refs[-1]
    param_refs = refs[1:-1]

    h = x_ref[...]                                   # native dtype (f32 or bf16)
    carry_dtype = jnp.float32 if carry_f32 else h.dtype
    n_linear = num_hidden_layers + 1                 # hidden layers + final proj
    for i in range(n_linear):
        w = param_refs[2 * i][...]                            # [in, out]
        b = param_refs[2 * i + 1][...].astype(jnp.float32)    # [1, out]
        acc = jnp.dot(h.astype(w.dtype), w,
                      preferred_element_type=jnp.float32) + b
        if i < num_hidden_layers:
            # ReLU (nn.Dropout is identity at inference).
            h = jnp.maximum(acc, 0.0).astype(carry_dtype)
        else:
            # Narrow store: only the real out_dim columns go back to HBM.
            o_ref[...] = acc[:, :out_dim].astype(o_ref.dtype)


def _round_up(n: int, m: int) -> int:
    return ((n + m - 1) // m) * m


def _device_vmem_bytes(default=64 * 2**20) -> int:
    """Physical per-core VMEM; conservative 64 MiB default if query fails."""
    try:
        return int(getattr(pltpu.get_tpu_info(), "vmem_capacity_bytes", default))
    except Exception:  # query-only fallback; does not mask kernel errors
        return default


def tunable_mlp_forward(x, params, *, batch_tile=1024, carry_f32=False):
    """Fused TunableMLP forward.

    x:          [B, input_dim]
    params:     list of (W[in, out], b[out]) per Linear layer, final (out=3) last.
    batch_tile: rows per grid step (sweep 1024-4096+ on real workloads).
    carry_f32:  keep inter-layer activations in f32 (recommended on v5e when
                running bf16 inputs/params).
    """
    B, in_dim = x.shape
    num_hidden = len(params) - 1
    out_dim = int(params[-1][0].shape[1])
    itemsize = x.dtype.itemsize

    # --- lane-align the final projection for the MXU (compute only) ---------
    lane_pad = max(128, _round_up(out_dim, 128))
    w_out, b_out = params[-1]
    if lane_pad != out_dim:
        w_out = jnp.pad(w_out, ((0, 0), (0, lane_pad - out_dim)))
        b_out = jnp.pad(b_out, (0, lane_pad - out_dim))
    padded_params = list(params[:-1]) + [(w_out, b_out)]

    # --- batch tiling: big tiles, no wrapper-side pad copy -------------------
    # Only pad x in the degenerate B < 8 case (sublane minimum).
    B_p = B if B >= 8 else 8
    x_p = x if B_p == B else jnp.pad(x, ((0, B_p - B), (0, 0)))
    bt = max(8, min(_round_up(int(batch_tile), 8), (B_p // 8) * 8))
    # v7x megacore: keep >= 2 grid steps when the batch is large enough for
    # the "parallel" axis to feed both TensorCores.
    if B_p >= 1024 and pl.cdiv(B_p, bt) < 2:
        bt = max(8, _round_up(pl.cdiv(B_p, 2), 8))
    grid = (pl.cdiv(B_p, bt),)   # ragged tail handled by edge-block masking

    # --- flatten params; biases as [1, out] (sublane, lane layout) ----------
    flat = []
    for w, b in padded_params:
        flat += [w, b.reshape(1, -1)]

    # --- VMEM budget, clamped to the actual device (v7x: 64 MiB/TC) ---------
    w_bytes = sum(int(a.size) * a.dtype.itemsize for a in flat)
    max_width = max(int(w.shape[1]) for w, _ in padded_params)
    vmem_est = (2 * w_bytes
                + 2 * bt * in_dim * itemsize          # double-buffered x tile
                + 2 * bt * out_dim * itemsize         # double-buffered out tile
                + 3 * bt * max_width * 4)             # f32 acc / carried h
    vmem_ceiling = int(0.70 * _device_vmem_bytes())
    vmem_limit = int(min(max(2 * vmem_est, 16 * 2**20), vmem_ceiling))

    # --- advisory cost estimate ----------------------------------------------
    flops = sum(2 * B_p * int(w.shape[0]) * int(w.shape[1])
                for w, _ in padded_params)
    bytes_accessed = (int(x_p.size) * itemsize + w_bytes
                      + B_p * out_dim * itemsize)
    cost = pl.CostEstimate(flops=int(flops), transcendentals=0,
                           bytes_accessed=int(bytes_accessed))

    kernel = functools.partial(_mlp_kernel, num_hidden, out_dim, carry_f32)

    in_specs = [pl.BlockSpec((bt, in_dim), lambda i: (i, 0))]
    # Weights/biases: full-array blocks, constant index_map (resident in VMEM).
    in_specs += [pl.BlockSpec(arr.shape, lambda i: (0, 0)) for arr in flat]

    out = pl.pallas_call(
        kernel,
        out_shape=jax.ShapeDtypeStruct((B_p, out_dim), x.dtype),
        grid_spec=pltpu.PrefetchScalarGridSpec(
            num_scalar_prefetch=0,
            grid=grid,
            in_specs=in_specs,
            out_specs=pl.BlockSpec((bt, out_dim), lambda i: (i, 0)),
        ),
        compiler_params=pltpu.CompilerParams(
            dimension_semantics=("parallel",),
            vmem_limit_bytes=vmem_limit,
        ),
        cost_estimate=cost,
    )(x_p, *flat)

    return out if B_p == B else out[:B]


def init_params(key, input_dim, num_layers, hidden_dim, out_dim=3):
    """Deterministic synthetic init (torch nn.Linear stores W as [out, in];
    here weights are pre-transposed to [in, out])."""
    params = []
    in_dim = input_dim
    dims = [hidden_dim] * num_layers + [out_dim]
    for d in dims:
        key, kw, kb = jax.random.split(key, 3)
        scale = 1.0 / jnp.sqrt(in_dim)
        w = jax.random.uniform(kw, (in_dim, d), jnp.float32, -scale, scale)
        b = jax.random.uniform(kb, (d,), jnp.float32, -scale, scale)
        params.append((w, b))
        in_dim = d
    return params


def mlp_reference(x, params):
    h = x
    for i, (w, b) in enumerate(params):
        h = h @ w + b
        if i < len(params) - 1:
            h = jnp.maximum(h, 0.0)
    return h


if __name__ == "__main__":
    # Shapes consistent with TunableMLP(input_dim=32, num_layers=2,
    # hidden_dim=32, dropout=0.1), small batch.
    input_dim, num_layers, hidden_dim = 32, 2, 32

    key = jax.random.PRNGKey(0)
    key, kx = jax.random.split(key)
    B = 16
    x = jax.random.normal(kx, (B, input_dim), jnp.float32)
    params = init_params(key, input_dim, num_layers, hidden_dim)

    out = jax.block_until_ready(tunable_mlp_forward(x, params))
    ref = mlp_reference(x, params)
    assert out.shape == (B, 3)
    assert jnp.allclose(out, ref, atol=1e-4, rtol=1e-4)

    # Ragged batch + multi-step grid: exercises edge-block masking on both the
    # input read and the narrow (bt, 3) output store, plus the parallel axis.
    B2 = 300
    key, kx2 = jax.random.split(key)
    x2 = jax.random.normal(kx2, (B2, input_dim), jnp.float32)
    out2 = jax.block_until_ready(tunable_mlp_forward(x2, params, batch_tile=128))
    ref2 = mlp_reference(x2, params)
    assert out2.shape == (B2, 3)
    assert jnp.allclose(out2, ref2, atol=1e-4, rtol=1e-4)

    print("KERNEL_OK")
</pallas_src>

<mosaic_0001>
module attributes {stable_mosaic.version = 11 : i64} {
  func.func @_mlp_kernel(%arg0: i32, %arg1: memref<16x32xf32, #tpu.memory_space<vmem>>, %arg2: memref<32x32xf32, #tpu.memory_space<vmem>>, %arg3: memref<1x32xf32, #tpu.memory_space<vmem>>, %arg4: memref<32x32xf32, #tpu.memory_space<vmem>>, %arg5: memref<1x32xf32, #tpu.memory_space<vmem>>, %arg6: memref<32x128xf32, #tpu.memory_space<vmem>>, %arg7: memref<1x128xf32, #tpu.memory_space<vmem>>, %arg8: memref<16x3xf32, #tpu.memory_space<vmem>>) attributes {dimension_semantics = [#tpu.dimension_semantics<parallel>], iteration_bounds = array<i64: 1>, scalar_prefetch = 0 : i64, scratch_operands = 0 : i64, tpu.core_type = #tpu.core_type<tc>, window_params = [{transform_indices = @transform_0, window_bounds = array<i64: 16, 32>}, {pipeline_mode = #tpu.pipeline_mode<synchronous>, transform_indices = @transform_1, window_bounds = array<i64: 32, 32>}, {pipeline_mode = #tpu.pipeline_mode<synchronous>, transform_indices = @transform_2, window_bounds = array<i64: 1, 32>}, {pipeline_mode = #tpu.pipeline_mode<synchronous>, transform_indices = @transform_3, window_bounds = array<i64: 32, 32>}, {pipeline_mode = #tpu.pipeline_mode<synchronous>, transform_indices = @transform_4, window_bounds = array<i64: 1, 32>}, {pipeline_mode = #tpu.pipeline_mode<synchronous>, transform_indices = @transform_5, window_bounds = array<i64: 32, 128>}, {pipeline_mode = #tpu.pipeline_mode<synchronous>, transform_indices = @transform_6, window_bounds = array<i64: 1, 128>}, {transform_indices = @transform_7, window_bounds = array<i64: 16, 3>}]} {
    %c0 = arith.constant 0 : index
    %c0_0 = arith.constant 0 : index
    %0 = vector.load %arg1[%c0, %c0_0] : memref<16x32xf32, #tpu.memory_space<vmem>>, vector<16x32xf32>
    %c0_1 = arith.constant 0 : index
    %c0_2 = arith.constant 0 : index
    %1 = vector.load %arg2[%c0_1, %c0_2] : memref<32x32xf32, #tpu.memory_space<vmem>>, vector<32x32xf32>
    %c0_3 = arith.constant 0 : index
    %c0_4 = arith.constant 0 : index
    %2 = vector.load %arg3[%c0_3, %c0_4] : memref<1x32xf32, #tpu.memory_space<vmem>>, vector<1x32xf32>
    %cst = arith.constant dense<0.000000e+00> : vector<16x32xf32>
    %3 = tpu.matmul %0, %1, %cst {dimension_numbers = #tpu.dot_dimension_numbers<[1], [0], [0], [1], [0, 0, 1, 1], [], []>} : vector<16x32xf32>, vector<32x32xf32>, vector<16x32xf32> -> vector<16x32xf32>
    %4 = vector.broadcast %2 : vector<1x32xf32> to vector<16x32xf32>
    %5 = arith.addf %3, %4 : vector<16x32xf32>
    %cst_5 = arith.constant 0.000000e+00 : f32
    %6 = vector.broadcast %cst_5 : f32 to vector<16x32xf32>
    %7 = arith.maximumf %5, %6 : vector<16x32xf32>
    %c0_6 = arith.constant 0 : index
    %c0_7 = arith.constant 0 : index
    %8 = vector.load %arg4[%c0_6, %c0_7] : memref<32x32xf32, #tpu.memory_space<vmem>>, vector<32x32xf32>
    %c0_8 = arith.constant 0 : index
    %c0_9 = arith.constant 0 : index
    %9 = vector.load %arg5[%c0_8, %c0_9] : memref<1x32xf32, #tpu.memory_space<vmem>>, vector<1x32xf32>
    %cst_10 = arith.constant dense<0.000000e+00> : vector<16x32xf32>
    %10 = tpu.matmul %7, %8, %cst_10 {dimension_numbers = #tpu.dot_dimension_numbers<[1], [0], [0], [1], [0, 0, 1, 1], [], []>} : vector<16x32xf32>, vector<32x32xf32>, vector<16x32xf32> -> vector<16x32xf32>
    %11 = vector.broadcast %9 : vector<1x32xf32> to vector<16x32xf32>
    %12 = arith.addf %10, %11 : vector<16x32xf32>
    %cst_11 = arith.constant 0.000000e+00 : f32
    %13 = vector.broadcast %cst_11 : f32 to vector<16x32xf32>
    %14 = arith.maximumf %12, %13 : vector<16x32xf32>
    %c0_12 = arith.constant 0 : index
    %c0_13 = arith.constant 0 : index
    %15 = vector.load %arg6[%c0_12, %c0_13] : memref<32x128xf32, #tpu.memory_space<vmem>>, vector<32x128xf32>
    %c0_14 = arith.constant 0 : index
    %c0_15 = arith.constant 0 : index
    %16 = vector.load %arg7[%c0_14, %c0_15] : memref<1x128xf32, #tpu.memory_space<vmem>>, vector<1x128xf32>
    %cst_16 = arith.constant dense<0.000000e+00> : vector<16x128xf32>
    %17 = tpu.matmul %14, %15, %cst_16 {dimension_numbers = #tpu.dot_dimension_numbers<[1], [0], [0], [1], [0, 0, 1, 1], [], []>} : vector<16x32xf32>, vector<32x128xf32>, vector<16x128xf32> -> vector<16x128xf32>
    %18 = vector.broadcast %16 : vector<1x128xf32> to vector<16x128xf32>
    %19 = arith.addf %17, %18 : vector<16x128xf32>
    %20 = vector.extract_strided_slice %19 {offsets = [0, 0], sizes = [16, 3], strides = [1, 1]} : vector<16x128xf32> to vector<16x3xf32>
    %c0_17 = arith.constant 0 : index
    %c0_18 = arith.constant 0 : index
    %21 = vector.load %arg8[%c0_17, %c0_18] : memref<16x3xf32, #tpu.memory_space<vmem>>, vector<16x3xf32>
    tpu.vector_store %arg8[%c0_17, %c0_18], %20 {strides = array<i32>} : memref<16x3xf32, #tpu.memory_space<vmem>>, vector<16x3xf32>,
    return
  }
  func.func @transform_0(%arg0: i32) -> (i32, i32) {
    %c0_i32 = arith.constant 0 : i32
    %c0_i32_0 = arith.constant 0 : i32
    return %arg0, %c0_i32 : i32, i32
  }
  func.func @transform_1(%arg0: i32) -> (i32, i32) {
    %c0_i32 = arith.constant 0 : i32
    %c0_i32_0 = arith.constant 0 : i32
    %c0_i32_1 = arith.constant 0 : i32
    return %c0_i32, %c0_i32_0 : i32, i32
  }
  func.func @transform_2(%arg0: i32) -> (i32, i32) {
    %c0_i32 = arith.constant 0 : i32
    %c0_i32_0 = arith.constant 0 : i32
    %c0_i32_1 = arith.constant 0 : i32
    return %c0_i32, %c0_i32_0 : i32, i32
  }
  func.func @transform_3(%arg0: i32) -> (i32, i32) {
    %c0_i32 = arith.constant 0 : i32
    %c0_i32_0 = arith.constant 0 : i32
    %c0_i32_1 = arith.constant 0 : i32
    return %c0_i32, %c0_i32_0 : i32, i32
  }
  func.func @transform_4(%arg0: i32) -> (i32, i32) {
    %c0_i32 = arith.constant 0 : i32
    %c0_i32_0 = arith.constant 0 : i32
    %c0_i32_1 = arith.constant 0 : i32
    return %c0_i32, %c0_i32_0 : i32, i32
  }
  func.func @transform_5(%arg0: i32) -> (i32, i32) {
    %c0_i32 = arith.constant 0 : i32
    %c0_i32_0 = arith.constant 0 : i32
    %c0_i32_1 = arith.constant 0 : i32
    return %c0_i32, %c0_i32_0 : i32, i32
  }
  func.func @transform_6(%arg0: i32) -> (i32, i32) {
    %c0_i32 = arith.constant 0 : i32
    %c0_i32_0 = arith.constant 0 : i32
    %c0_i32_1 = arith.constant 0 : i32
    return %c0_i32, %c0_i32_0 : i32, i32
  }
  func.func @transform_7(%arg0: i32) -> (i32, i32) {
    %c0_i32 = arith.constant 0 : i32
    %c0_i32_0 = arith.constant 0 : i32
    return %arg0, %c0_i32 : i32, i32
  }
}

</mosaic_0001>

<bundles_post_ra>
// kernel: tpu_custom_call.1
= control target key start
LH: loop header
LB: loop body
LE: loop exit
PB: predicated region body
PF: predicated region fallthrough
CT: control target
= control target key end

     0   :  { %12 = vsyncpa [#allocation3], 0  ;;  %s617_s0 = inlined_call_operand.hbm [shape: f32[16,32], index: 0, kind: input, shape index: {}]   ;;  %s618_s1 = inlined_call_operand.hbm [shape: f32[32,32], index: 1, kind: input, shape index: {}]   ;;  %s619_s2 = inlined_call_operand.vmem [shape: f32[1,32], index: 2, kind: input, shape index: {}]   ;;  %s620_s3 = inlined_call_operand.hbm [shape: f32[32,32], index: 3, kind: input, shape index: {}]   ;;  %s621_s4 = inlined_call_operand.vmem [shape: f32[1,32], index: 4, kind: input, shape index: {}]   ;;  %s622_s5 = inlined_call_operand.hbm [shape: f32[32,128], index: 5, kind: input, shape index: {}]   ;;  %s623_s6 = inlined_call_operand.vmem [shape: f32[1,128], index: 6, kind: input, shape index: {}]   ;;  %s624_s7 = inlined_call_operand.vmem [shape: f32[16,3], index: 7, kind: output, shape index: {}]  }
   0x1   :  { %13 = vsyncpa [#allocation5], 0 }
   0x2   :  { %14 = vsyncpa [#allocation8], 0  ;;  %s526_s24 = smov [#allocation4]   ;;  %s527_s26 = smov [#allocation2]  }
   0x3   :  { %s32_s25 = sshll.u32 %s526_s24, 4  ;;  %s20_s27 = sshll.u32 %s527_s26, 4  ;;  %s33_s25 = int_to_ptr.vmem [resolvable:$true] %s32_s25  ;;  %s21_s27 = int_to_ptr.vmem [resolvable:$true] %s20_s27 }
   0x4   :  { %s448_s28 = scalar_lea.vmem %s33_s25, 512  ;;  %p453_p1 = scmp.lt.s32.totalorder %s33_s25, %s33_s25 }
   0x5   :  { %p449_p0 = scmp.ne.s32.totalorder %s33_s25, %s448_s28  ;;  %p454_p2 = scmp.lt.s32.totalorder %s448_s28, %s448_s28 }
   0x7   :  { %p455_p3 = por %p454_p2, %p453_p1 }
   0x9   :  { %p456_p4 = pnand %p455_p3, %p449_p0 }
   0xb   :  { %459 = shalt.err (!%p456_p4)
}
   0xc   :  { %s528_s29 = smov 128   ;;  %s529_s30 = smov 8  }
   0xd   :  { %38 = dma.hbm_to_vmem [thread:$0]  %s618_s1, 512, %s33_s25, [#allocation5], %s528_s29, %s528_s29, %s529_s30  }
   0xe   :  { %s468_s10 = scalar_lea.vmem %s21_s27, 256  ;;  %p473_p6 = scmp.lt.s32.totalorder %s21_s27, %s21_s27 }
   0xf   :  { %p469_p5 = scmp.ne.s32.totalorder %s21_s27, %s468_s10  ;;  %p474_p7 = scmp.lt.s32.totalorder %s468_s10, %s468_s10 }
  0x11   :  { %p475_p8 = por %p474_p7, %p473_p6 }
  0x13   :  { %p476_p9 = pnand %p475_p8, %p469_p5 }
  0x15   :  { %479 = shalt.err (!%p476_p9)
}
  0x16   :  { %26 = dma.hbm_to_vmem [thread:$0]  %s617_s0, 256, %s21_s27, [#allocation3], %s528_s29, %s528_s29, %s529_s30  }
  0x17   :  { %s530_s13 = smov [#allocation6]   ;;  %s531_s15 = smov [#allocation7]  }
  0x18   :  { %s46_s14 = sshll.u32 %s530_s13, 4  ;;  %s60_s16 = sshll.u32 %s531_s15, 4  ;;  %s47_s14 = int_to_ptr.vmem [resolvable:$true] %s46_s14  ;;  %s61_s16 = int_to_ptr.vmem [resolvable:$true] %s60_s16 }
  0x19   :  { %s488_s1 = scalar_lea.vmem %s47_s14, 512  ;;  %p493_p11 = scmp.lt.s32.totalorder %s47_s14, %s47_s14 }
  0x1a   :  { %p489_p10 = scmp.ne.s32.totalorder %s47_s14, %s488_s1  ;;  %p494_p12 = scmp.lt.s32.totalorder %s488_s1, %s488_s1 }
  0x1c   :  { %p495_p13 = por %p494_p12, %p493_p11 }
  0x1e   :  { %p496_p0 = pnand %p495_p13, %p489_p10 }
  0x20   :  { %499 = shalt.err (!%p496_p0)
}
  0x21   :  { %52 = dma.hbm_to_vmem [thread:$0]  %s620_s3, 512, %s47_s14, [#allocation5], %s528_s29, %s528_s29, %s529_s30  }
  0x22   :  { %s508_s0 = scalar_lea.vmem %s61_s16, 512  ;;  %p513_p2 = scmp.lt.s32.totalorder %s61_s16, %s61_s16 }
  0x23   :  { %p509_p1 = scmp.ne.s32.totalorder %s61_s16, %s508_s0  ;;  %p514_p3 = scmp.lt.s32.totalorder %s508_s0, %s508_s0 }
  0x25   :  { %p515_p4 = por %p514_p3, %p513_p2 }
  0x27   :  { %p516_p5 = pnand %p515_p4, %p509_p1 }
  0x29   :  { %519 = shalt.err (!%p516_p5)
}
  0x2a   :  { %66 = dma.hbm_to_vmem [thread:$0]  %s622_s5, 512, %s61_s16, [#allocation8], %s528_s29, %s528_s29, %s529_s30  }
  0x2b   :  { %520 = dma.done.wait [#allocation3], 256  }
  0x2c   :  { %521 = vsyncadd [#allocation3], 4294967040 }
  0x2d   :  { %522 = dma.done.wait [#allocation5], 1024  }
  0x2e   :  { %523 = vsyncadd [#allocation5], 4294966272 }
  0x2f   :  { %524 = dma.done.wait [#allocation8], 512  }
  0x30   :  { %525 = vsyncadd [#allocation8], 4294966784  ;;  %vm94_vm0 = vcmask 261120   ;;  %v86_v0 = vld [vmem:[#allocation4 + $0x18] sm:$0xff]  ;;  %v85_v1 = vld [vmem:[#allocation4 + $0x10] sm:$0xff]  ;;  %vm364_vm1 = vcmask 23552  }
  0x31   :  { %401 = vmatprep.subr.mxu0 %v86_v0  ;;  %v81_v2 = vld [vmem:[#allocation2] sm:$0xff]  ;;  %v84_v3 = vld [vmem:[#allocation4 + $0x8] sm:$0xff]  ;;  %v83_v4 = vld [vmem:[#allocation4] sm:$0xff] }
  0x32   :  { %402 = vmatpush3.msra.mxu0 %v86_v0  ;;  %409 = vmatprep.mubr.msk.f32.mxu0 %vm94_vm0, %v81_v2  ;;  %v82_v5 = vld [vmem:[#allocation2 + $0x8] sm:$0xff]  ;;  %v180_v7 = vld [vmem:[#allocation6 + $0x10] sm:$0xff]  ;;  %v179_v8 = vld [vmem:[#allocation6 + $0x8] sm:$0xff] }
  0x33   :  { %403 = vmatprep.subr.mxu0 %v85_v1  ;;  %v181_v6 = vld [vmem:[#allocation6 + $0x18] sm:$0xff]  ;;  %v178_v9 = vld [vmem:[#allocation6] sm:$0xff]  ;;  %v374_v10 = vld [vmem:[%s619_s2] ss:$0 sm:$0xff] }
  0x34   :  { %404 = vmatpush3.msra.mxu0 %v85_v1  ;;  %412 = vmatprep.subr.mxu1 %v181_v6  ;;  %v275_v17 = vld [vmem:[#allocation7 + $0x18] sm:$0xff]  ;;  %v274_v18 = vld [vmem:[#allocation7 + $0x10] sm:$0xff]  ;;  %v273_v19 = vld [vmem:[#allocation7 + $0x8] sm:$0xff] }
  0x35   :  { %405 = vmatprep.subr.mxu0 %v84_v3  ;;  %413 = vmatpush3.msra.mxu1 %v181_v6  ;;  %v272_v20 = vld [vmem:[#allocation7] sm:$0xff]  ;;  %v377_v21 = vld [vmem:[%s621_s4] ss:$0 sm:$0xff] }
  0x36   :  { %406 = vmatpush3.msra.mxu0 %v84_v3  ;;  %414 = vmatprep.subr.mxu1 %v180_v7  ;;  %v380_v28 = vld [vmem:[%s623_s6] ss:$0 sm:$0xff] }
  0x37   :  { %407 = vmatprep.subr.mxu0 %v83_v4  ;;  %415 = vmatpush3.msra.mxu1 %v180_v7 }
  0x38   :  { %408 = vmatpush3.msra.mxu0 %v83_v4  ;;  %416 = vmatprep.subr.mxu1 %v179_v8 }
  0x39   :  { %410 = vmatmul.mubr.msk.f32.vlgmr.msra.gmra.mxu0 %vm94_vm0, %v82_v5  ;;  %417 = vmatpush3.msra.mxu1 %v179_v8 }
  0x3a   :  { %418 = vmatprep.subr.mxu1 %v178_v9  ;;  %423 = vmatprep.subr.mxu0 %v275_v17 }
  0x3b   :  { %419 = vmatpush3.msra.mxu1 %v178_v9  ;;  %424 = vmatpush3.msra.mxu0 %v275_v17 }
  0x3c   :  { %425 = vmatprep.subr.mxu0 %v274_v18 }
  0x3d   :  { %426 = vmatpush3.msra.mxu0 %v274_v18 }
  0x3e   :  { %427 = vmatprep.subr.mxu0 %v273_v19 }
  0x3f   :  { %428 = vmatpush3.msra.mxu0 %v273_v19 }
  0x40   :  { %429 = vmatprep.subr.mxu0 %v272_v20 }
  0x41   :  { %430 = vmatpush3.msra.mxu0 %v272_v20 }
  0xf9   :  { %v411_v11 = vpop.f32.mrf.mxu0 }
  0xfa   :  { %v173_v12 = vadd.f32 %v411_v11, %v374_v10 }
  0xfb   :  { %v167_v13 = vpop.f32.mrf.mxu0 }
  0xfc   :  { %v168_v14 = vadd.f32 %v374_v10, %v167_v13  ;;  %v177_v16 = vmax.f32 %v173_v12, 0.0 }
  0xfe   :  { %v176_v15 = vmax.f32 %v168_v14, 0.0 }
 0x100   :  { %420 = vmatprep.mubr.msk.f32.mxu1 %vm94_vm0, %v176_v15 }
 0x101   :  { %421 = vmatmul.mubr.msk.f32.vlgmr.msra.gmra.mxu1 %vm94_vm0, %v177_v16 }
 0x1c1   :  { %v422_v22 = vpop.f32.mrf.mxu1 }
 0x1c2   :  { %v267_v23 = vadd.f32 %v422_v22, %v377_v21 }
 0x1c3   :  { %v261_v24 = vpop.f32.mrf.mxu1 }
 0x1c4   :  { %v262_v25 = vadd.f32 %v377_v21, %v261_v24  ;;  %v271_v27 = vmax.f32 %v267_v23, 0.0 }
 0x1c6   :  { %v270_v26 = vmax.f32 %v262_v25, 0.0 }
 0x1c8   :  { %431 = vmatprep.mubr.msk.f32.mxu0 %vm94_vm0, %v270_v26 }
 0x1c9   :  { %432 = vmatmul.mubr.msk.f32.vlgmr.msra.gmra.mxu0 %vm94_vm0, %v271_v27 }
 0x289   :  { %v433_v29 = vpop.f32.mrf.mxu0 }
 0x28a   :  { %v361_v30 = vadd.f32 %v433_v29, %v380_v28 }
 0x28b   :  { %v355_v31 = vpop.f32.mrf.mxu0 }
 0x28c   :  { %366 = vst.msk [vmem:[%s624_s7 + $0x8] sm:$0xff] %vm364_vm1, %v361_v30  ;;  %v356_v32 = vadd.f32 %v380_v28, %v355_v31 }
 0x28e   :  { %365 = vst.msk [vmem:[%s624_s7] sm:$0xff] %vm364_vm1, %v356_v32 }
 0x28f   :  { %371 = vsyncpa [#allocation3], 1 }
 0x290   :  { %372 = vsyncpa [#allocation5], 1 }
 0x291   :  { %373 = vsyncpa [#allocation8], 1 }

</bundles_post_ra>
